<compile_context>
chip_gen: v6e
topology: v6e:2x2x1
jax: 0.10.0
libtpu: 0.0.40
codegen_flags: <defaults>
</compile_context>

<pallas_src>
import functools
import math

import jax
import jax.numpy as jnp
from jax.experimental import pallas as pl
from jax.experimental.pallas import tpu as pltpu

# matrix_exp approximation parameters (static, compiled into the kernel).
_DEFAULT_NUM_SQUARINGS = 2   # scale skew by 2^-2, then square twice
_TAYLOR_ORDER = 8            # degree-8 Taylor via Paterson-Stockmeyer

_INV_FACT = tuple(1.0 / math.factorial(k) for k in range(_TAYLOR_ORDER + 1))

_VMEM_BUDGET_BYTES = 40 * 1024 * 1024   # working budget for block sizing
_VMEM_LIMIT_BYTES = 48 * 1024 * 1024    # declared scoped-VMEM limit


def _ortho_param_kernel(t_ref, base_ref, out_ref, *, rows_le_cols: bool,
                        num_squarings: int):
    """out[b] = expm((T[b] - T[b]^T)/2) applied to base[b] for a batch block."""
    n = t_ref.shape[-1]

    t = t_ref[...]
    if t.dtype != jnp.float32:
        t = t.astype(jnp.float32)

    # Skew-symmetrization fused with the 2^-s scaling of scaling-and-squaring:
    #   A = (T - T^T) * (0.5 / 2^s).  swapaxes (not .T) on the 3-D block.
    a = (t - jnp.swapaxes(t, -1, -2)) * jnp.float32(0.5 / (2.0 ** num_squarings))

    # Batched matmul over the block's batch dim, f32 accumulation on the MXU.
    bmm = functools.partial(jnp.einsum, "bij,bjk->bik",
                            preferred_element_type=jnp.float32)

    # Degree-8 Taylor, Paterson-Stockmeyer style:
    #   exp(A) ~= I + A + c2 A2 + c3 A3 + c4 A4
    #               + A4 @ (c5 A + c6 A2 + c7 A3 + c8 A4)
    # Serial matmul depth: A2 -> {A3, A4} -> (A4 @ high) = 3.
    c = _INV_FACT
    a2 = bmm(a, a)
    a3 = bmm(a, a2)
    a4 = bmm(a2, a2)
    high = c[5] * a + c[6] * a2 + c[7] * a3 + c[8] * a4
    poly = a + c[2] * a2 + c[3] * a3 + c[4] * a4 + bmm(a4, high)

    # Single identity add, built once per grid step and broadcast over the
    # batch (TPU iota must be >= 2-D).
    row_idx = jax.lax.broadcasted_iota(jnp.int32, (n, n), 0)
    col_idx = jax.lax.broadcasted_iota(jnp.int32, (n, n), 1)
    eye = jnp.where(row_idx == col_idx, jnp.float32(1.0), jnp.float32(0.0))
    expm = poly + eye[None, :, :]

    # Repeated squaring: exp(A) = (exp(A / 2^s))^(2^s).
    for _ in range(num_squarings):
        expm = bmm(expm, expm)

    # Apply the rotation to the base point.
    base = base_ref[...]
    if base.dtype != jnp.float32:
        base = base.astype(jnp.float32)
    out = bmm(expm, base) if rows_le_cols else bmm(base, expm)
    out_ref[...] = out.astype(out_ref.dtype)


def _pick_block_batch(batch: int, n: int, rows: int, cols: int) -> int:
    """Pick matrices-per-grid-step: as large as VMEM allows, but >= 2 steps
    when batch >= 2 so the 'parallel' axis can shard across v7x's two TCs."""
    bt = max(1, (batch + 1) // 2)

    def footprint(b):
        # double-buffered in/out blocks + ~8 live f32 (n,n) temporaries per
        # matrix (a, a2, a3, a4, high, poly/expm, einsum scratch).
        per_matrix = 4 * (2 * (n * n + 2 * rows * cols) + 8 * n * n)
        return b * per_matrix + 4 * n * n  # + eye

    while bt > 1 and footprint(bt) > _VMEM_BUDGET_BYTES:
        bt = (bt + 1) // 2
    return bt


def orthogonal_parametrization_forward(tangents: jax.Array, bases: jax.Array,
                                        *, num_squarings: int = _DEFAULT_NUM_SQUARINGS
                                        ) -> jax.Array:
    """Pallas-backed equivalent of OrthogonalParametrization.forward.

    tangents: (B, n, n) or (n, n);  bases: (B, rows, cols) or (rows, cols),
    with n = min(rows, cols).  Returns output(s) in bases.dtype.

    num_squarings=2 is accurate (rel. err <~1e-6) for ||skew||_2 <= ~4;
    raise it for larger tangent norms.
    """
    squeeze = tangents.ndim == 2
    if squeeze:
        tangents = tangents[None]
        bases = bases[None]

    B, rows, cols = bases.shape
    n = tangents.shape[-1]
    rows_le_cols = rows <= cols
    assert tangents.shape == (B, n, n)
    assert n == (rows if rows_le_cols else cols)

    bt = _pick_block_batch(B, n, rows, cols)
    num_steps = pl.cdiv(B, bt)
    b_pad = num_steps * bt
    if b_pad != B:
        # Zero-pad: expm(0) = I and I @ 0 = 0, so padded rows are harmless.
        tangents = jnp.concatenate(
            [tangents, jnp.zeros((b_pad - B, n, n), tangents.dtype)], axis=0)
        bases = jnp.concatenate(
            [bases, jnp.zeros((b_pad - B, rows, cols), bases.dtype)], axis=0)

    kernel = functools.partial(_ortho_param_kernel,
                               rows_le_cols=rows_le_cols,
                               num_squarings=num_squarings)

    # Advisory cost estimate: A2, A3, A4, A4@high, s squarings on (n,n),
    # plus expm applied to the (rows, cols) base.
    num_nn_matmuls = 4 + num_squarings
    flops = int(b_pad * (2 * n * n * n * num_nn_matmuls + 2 * rows * n * cols))
    bytes_accessed = int(
        tangents.size * tangents.dtype.itemsize
        + bases.size * bases.dtype.itemsize
        + b_pad * rows * cols * bases.dtype.itemsize)
    cost = pl.CostEstimate(flops=flops, transcendentals=0,
                           bytes_accessed=bytes_accessed)

    out = pl.pallas_call(
        kernel,
        out_shape=jax.ShapeDtypeStruct((b_pad, rows, cols), bases.dtype),
        grid=(num_steps,),
        in_specs=[
            # Last two dims are full-array, so the (8,128) tiling constraint
            # is satisfied; the batch dim is tiled by bt matrices per step.
            pl.BlockSpec((bt, n, n), lambda b: (b, 0, 0)),
            pl.BlockSpec((bt, rows, cols), lambda b: (b, 0, 0)),
        ],
        out_specs=pl.BlockSpec((bt, rows, cols), lambda b: (b, 0, 0)),
        compiler_params=pltpu.CompilerParams(
            dimension_semantics=("parallel",),      # megacore-shardable batch
            vmem_limit_bytes=_VMEM_LIMIT_BYTES,     # safe on v7x (64 MiB)
        ),
        cost_estimate=cost,
    )(tangents, bases)

    out = out[:B]
    return out[0] if squeeze else out


def _reference_forward(tangents: jax.Array, bases: jax.Array) -> jax.Array:
    """Pure-JAX reference mirroring the PyTorch module (sanity check)."""
    skew = (tangents - jnp.swapaxes(tangents, -1, -2)) / 2.0
    rot = jax.scipy.linalg.expm(skew)
    rows, cols = bases.shape[-2:]
    return rot @ bases if rows <= cols else bases @ rot


def _make_bases(key, batch: int, rows: int, cols: int) -> jax.Array:
    """Deterministic base points, mirroring right_inverse: base = U @ Vh."""
    w = jax.random.normal(key, (batch, rows, cols), dtype=jnp.float32)
    u, _, vh = jnp.linalg.svd(w, full_matrices=False)
    return u @ vh


if __name__ == "__main__":
    key = jax.random.PRNGKey(0)
    k_base, k_tan, k_base2, k_tan2 = jax.random.split(key, 4)

    # --- Wide weight matrices (rows <= cols branch): rot @ base -------------
    B, rows, cols = 8, 16, 32
    n = min(rows, cols)
    bases = _make_bases(k_base, B, rows, cols)
    tangents = 0.5 * jax.random.normal(k_tan, (B, n, n), dtype=jnp.float32)

    out = orthogonal_parametrization_forward(tangents, bases)
    out = jax.block_until_ready(out)

    ref = _reference_forward(tangents, bases)
    assert out.shape == (B, rows, cols)
    max_err = float(jnp.max(jnp.abs(out - ref)))
    assert max_err < 2e-4, f"wide: mismatch vs reference expm path: {max_err}"
    gram = jnp.einsum("bij,bkj->bik", out, out)   # rows stay orthonormal
    assert float(jnp.max(jnp.abs(gram - jnp.eye(rows)))) < 1e-3

    # --- Tall weight matrices (rows > cols branch, odd batch -> padding) ----
    B2, rows2, cols2 = 3, 32, 16
    n2 = min(rows2, cols2)
    bases2 = _make_bases(k_base2, B2, rows2, cols2)
    tangents2 = 0.5 * jax.random.normal(k_tan2, (B2, n2, n2), dtype=jnp.float32)

    out2 = orthogonal_parametrization_forward(tangents2, bases2)
    out2 = jax.block_until_ready(out2)

    ref2 = _reference_forward(tangents2, bases2)
    assert out2.shape == (B2, rows2, cols2)
    max_err2 = float(jnp.max(jnp.abs(out2 - ref2)))
    assert max_err2 < 2e-4, f"tall: mismatch vs reference expm path: {max_err2}"
    gram2 = jnp.einsum("bji,bjk->bik", out2, out2)  # columns stay orthonormal
    assert float(jnp.max(jnp.abs(gram2 - jnp.eye(cols2)))) < 1e-3

    print("KERNEL_OK")
</pallas_src>

<mosaic_0001>
module attributes {stable_mosaic.version = 11 : i64} {
  func.func @_ortho_param_kernel(%arg0: i32, %arg1: memref<4x16x16xf32, #tpu.memory_space<vmem>>, %arg2: memref<4x16x32xf32, #tpu.memory_space<vmem>>, %arg3: memref<4x16x32xf32, #tpu.memory_space<vmem>>) attributes {dimension_semantics = [#tpu.dimension_semantics<parallel>], iteration_bounds = array<i64: 2>, scalar_prefetch = 0 : i64, scratch_operands = 0 : i64, tpu.core_type = #tpu.core_type<tc>, window_params = [{transform_indices = @transform_0, window_bounds = array<i64: 4, 16, 16>}, {transform_indices = @transform_1, window_bounds = array<i64: 4, 16, 32>}, {transform_indices = @transform_2, window_bounds = array<i64: 4, 16, 32>}]} {
    %c0 = arith.constant 0 : index
    %c0_0 = arith.constant 0 : index
    %c0_1 = arith.constant 0 : index
    %0 = vector.load %arg1[%c0, %c0_0, %c0_1] : memref<4x16x16xf32, #tpu.memory_space<vmem>>, vector<4x16x16xf32>
    %1 = tpu.transpose %0, [0, 2, 1] : vector<4x16x16xf32> -> vector<4x16x16xf32>
    %2 = arith.subf %0, %1 : vector<4x16x16xf32>
    %cst = arith.constant 1.250000e-01 : f32
    %3 = vector.broadcast %cst : f32 to vector<4x16x16xf32>
    %4 = arith.mulf %2, %3 : vector<4x16x16xf32>
    "tpu.trace_start"() <{level = 10 : i32, message = "bij,bjk->bik"}> : () -> ()
    %cst_2 = arith.constant dense<0.000000e+00> : vector<4x16x16xf32>
    %5 = tpu.matmul %4, %4, %cst_2 {dimension_numbers = #tpu.dot_dimension_numbers<[2], [1], [1], [2], [0, 0, 0, 1, 1, 2], [0], [0]>} : vector<4x16x16xf32>, vector<4x16x16xf32>, vector<4x16x16xf32> -> vector<4x16x16xf32>
    %cst_3 = arith.constant dense<0.000000e+00> : vector<4x16x16xf32>
    %6 = tpu.matmul %4, %5, %cst_3 {dimension_numbers = #tpu.dot_dimension_numbers<[2], [1], [1], [2], [0, 0, 0, 1, 1, 2], [0], [0]>} : vector<4x16x16xf32>, vector<4x16x16xf32>, vector<4x16x16xf32> -> vector<4x16x16xf32>
    %cst_4 = arith.constant dense<0.000000e+00> : vector<4x16x16xf32>
    %7 = tpu.matmul %5, %5, %cst_4 {dimension_numbers = #tpu.dot_dimension_numbers<[2], [1], [1], [2], [0, 0, 0, 1, 1, 2], [0], [0]>} : vector<4x16x16xf32>, vector<4x16x16xf32>, vector<4x16x16xf32> -> vector<4x16x16xf32>
    "tpu.trace_stop"() : () -> ()
    %cst_5 = arith.constant 0.00833333377 : f32
    %8 = vector.broadcast %cst_5 : f32 to vector<4x16x16xf32>
    %9 = arith.mulf %8, %4 : vector<4x16x16xf32>
    %cst_6 = arith.constant 0.00138888892 : f32
    %10 = vector.broadcast %cst_6 : f32 to vector<4x16x16xf32>
    %11 = arith.mulf %10, %5 : vector<4x16x16xf32>
    %12 = arith.addf %9, %11 : vector<4x16x16xf32>
    %cst_7 = arith.constant 1.98412701E-4 : f32
    %13 = vector.broadcast %cst_7 : f32 to vector<4x16x16xf32>
    %14 = arith.mulf %13, %6 : vector<4x16x16xf32>
    %15 = arith.addf %12, %14 : vector<4x16x16xf32>
    %cst_8 = arith.constant 2.48015876E-5 : f32
    %16 = vector.broadcast %cst_8 : f32 to vector<4x16x16xf32>
    %17 = arith.mulf %16, %7 : vector<4x16x16xf32>
    %18 = arith.addf %15, %17 : vector<4x16x16xf32>
    %cst_9 = arith.constant 5.000000e-01 : f32
    %19 = vector.broadcast %cst_9 : f32 to vector<4x16x16xf32>
    %20 = arith.mulf %19, %5 : vector<4x16x16xf32>
    %21 = arith.addf %4, %20 : vector<4x16x16xf32>
    %cst_10 = arith.constant 0.166666672 : f32
    %22 = vector.broadcast %cst_10 : f32 to vector<4x16x16xf32>
    %23 = arith.mulf %22, %6 : vector<4x16x16xf32>
    %24 = arith.addf %21, %23 : vector<4x16x16xf32>
    %cst_11 = arith.constant 0.0416666679 : f32
    %25 = vector.broadcast %cst_11 : f32 to vector<4x16x16xf32>
    %26 = arith.mulf %25, %7 : vector<4x16x16xf32>
    %27 = arith.addf %24, %26 : vector<4x16x16xf32>
    "tpu.trace_start"() <{level = 10 : i32, message = "bij,bjk->bik"}> : () -> ()
    %cst_12 = arith.constant dense<0.000000e+00> : vector<4x16x16xf32>
    %28 = tpu.matmul %7, %18, %cst_12 {dimension_numbers = #tpu.dot_dimension_numbers<[2], [1], [1], [2], [0, 0, 0, 1, 1, 2], [0], [0]>} : vector<4x16x16xf32>, vector<4x16x16xf32>, vector<4x16x16xf32> -> vector<4x16x16xf32>
    "tpu.trace_stop"() : () -> ()
    %29 = arith.addf %27, %28 : vector<4x16x16xf32>
    %30 = tpu.iota {dimensions = array<i32: 0>} : vector<16x16xi32>
    %31 = tpu.iota {dimensions = array<i32: 1>} : vector<16x16xi32>
    %32 = arith.cmpi eq, %30, %31 : vector<16x16xi32>
    %cst_13 = arith.constant 1.000000e+00 : f32
    %cst_14 = arith.constant 0.000000e+00 : f32
    %33 = vector.broadcast %cst_13 : f32 to vector<16x16xf32>
    %34 = vector.broadcast %cst_14 : f32 to vector<16x16xf32>
    %35 = arith.select %32, %33, %34 : vector<16x16xi1>, vector<16x16xf32>
    %36 = vector.shape_cast %35 : vector<16x16xf32> to vector<1x16x16xf32>
    %37 = vector.broadcast %36 : vector<1x16x16xf32> to vector<4x16x16xf32>
    %38 = arith.addf %29, %37 : vector<4x16x16xf32>
    "tpu.trace_start"() <{level = 10 : i32, message = "bij,bjk->bik"}> : () -> ()
    %cst_15 = arith.constant dense<0.000000e+00> : vector<4x16x16xf32>
    %39 = tpu.matmul %38, %38, %cst_15 {dimension_numbers = #tpu.dot_dimension_numbers<[2], [1], [1], [2], [0, 0, 0, 1, 1, 2], [0], [0]>} : vector<4x16x16xf32>, vector<4x16x16xf32>, vector<4x16x16xf32> -> vector<4x16x16xf32>
    %cst_16 = arith.constant dense<0.000000e+00> : vector<4x16x16xf32>
    %40 = tpu.matmul %39, %39, %cst_16 {dimension_numbers = #tpu.dot_dimension_numbers<[2], [1], [1], [2], [0, 0, 0, 1, 1, 2], [0], [0]>} : vector<4x16x16xf32>, vector<4x16x16xf32>, vector<4x16x16xf32> -> vector<4x16x16xf32>
    "tpu.trace_stop"() : () -> ()
    %c0_17 = arith.constant 0 : index
    %c0_18 = arith.constant 0 : index
    %c0_19 = arith.constant 0 : index
    %41 = vector.load %arg2[%c0_17, %c0_18, %c0_19] : memref<4x16x32xf32, #tpu.memory_space<vmem>>, vector<4x16x32xf32>
    "tpu.trace_start"() <{level = 10 : i32, message = "bij,bjk->bik"}> : () -> ()
    %cst_20 = arith.constant dense<0.000000e+00> : vector<4x16x32xf32>
    %42 = tpu.matmul %40, %41, %cst_20 {dimension_numbers = #tpu.dot_dimension_numbers<[2], [1], [1], [2], [0, 0, 0, 1, 1, 2], [0], [0]>} : vector<4x16x16xf32>, vector<4x16x32xf32>, vector<4x16x32xf32> -> vector<4x16x32xf32>
    "tpu.trace_stop"() : () -> ()
    %c0_21 = arith.constant 0 : index
    %c0_22 = arith.constant 0 : index
    %c0_23 = arith.constant 0 : index
    %43 = vector.load %arg3[%c0_21, %c0_22, %c0_23] : memref<4x16x32xf32, #tpu.memory_space<vmem>>, vector<4x16x32xf32>
    tpu.vector_store %arg3[%c0_21, %c0_22, %c0_23], %42 {strides = array<i32>} : memref<4x16x32xf32, #tpu.memory_space<vmem>>, vector<4x16x32xf32>,
    return
  }
  func.func @transform_0(%arg0: i32) -> (i32, i32, i32) {
    %c0_i32 = arith.constant 0 : i32
    %c0_i32_0 = arith.constant 0 : i32
    %c0_i32_1 = arith.constant 0 : i32
    return %arg0, %c0_i32, %c0_i32_0 : i32, i32, i32
  }
  func.func @transform_1(%arg0: i32) -> (i32, i32, i32) {
    %c0_i32 = arith.constant 0 : i32
    %c0_i32_0 = arith.constant 0 : i32
    %c0_i32_1 = arith.constant 0 : i32
    return %arg0, %c0_i32, %c0_i32_0 : i32, i32, i32
  }
  func.func @transform_2(%arg0: i32) -> (i32, i32, i32) {
    %c0_i32 = arith.constant 0 : i32
    %c0_i32_0 = arith.constant 0 : i32
    %c0_i32_1 = arith.constant 0 : i32
    return %arg0, %c0_i32, %c0_i32_0 : i32, i32, i32
  }
}

</mosaic_0001>

<bundles_post_ra>
// kernel: tpu_custom_call.1
= control target key start
LH: loop header
LB: loop body
LE: loop exit
PB: predicated region body
PF: predicated region fallthrough
CT: control target
= control target key end

     0   :  { %7 = vsyncpa [#allocation3], 0  ;;  %s3928_s0 = inlined_call_operand.hbm [shape: f32[8,16,16], index: 0, kind: input, shape index: {}]   ;;  %s3929_s1 = inlined_call_operand.hbm [shape: f32[8,16,32], index: 1, kind: input, shape index: {}]   ;;  %s3930_s2 = inlined_call_operand.hbm [shape: f32[8,16,32], index: 2, kind: output, shape index: {}]  }
   0x1   :  { %9 = vsyncpa [#allocation3 + $0x1], 0 }
   0x2   :  { %10 = vsyncpa [#allocation6], 0 }
   0x3   :  { %12 = vsyncpa [#allocation6 + $0x1], 0 }
   0x4   :  { %13 = vsyncpa [#allocation4], 0 }
   0x5   :  { %15 = vsyncpa [#allocation4 + $0x1], 0  ;;  %s3457_s9 = smov 0   ;;  %s3459_s10 = smov 0  }
   0x6   :  { %s3461_s11 = smov 0   ;;  %s3463_s12 = smov 0  }
   0x7 LB: > { %s3478_s13 = sadd.s32 4294967295, %s3432_s12   ;;  %s2861_s14 = sadd.s32 4294967294, %s3432_s12   ;;  %s3432_s12 = sphi %s3463_s12, %s3946_s12   ;;  %s3428_s11 = sphi %s3461_s11, %s3945_s11   ;;  %s3424_s10 = sphi %s3459_s10, %s3944_s10   ;;  %s3420_s9 = sphi %s3457_s9, %s3943_s9  }
   0x8   : > { %s3482_s15 = sadd.s32 1, %s3432_s12   ;;  %s28_s16 = sadd.s32 1, %s3428_s11 }
   0x9   : > { %s25_s17 = ssub.s32 %s3432_s12, %s3482_s15  ;;  %p35_p0 = scmp.ne.s32.totalorder %s3428_s11, %s3424_s10 }
   0xa   : > { %p26_p1 = scmp.eq.s32.totalorder %s25_s17, 0  ;;  %p36_p2 = scmp.eq.s32.totalorder %s3432_s12, 0 }
   0xb   : > { %p41_p3 = scmp.ne.s32.totalorder %s3424_s10, %s3420_s9  ;;  %p42_p4 = scmp.eq.s32.totalorder %s3478_s13, 0 }
   0xc   : > { %s3494_s18 = scalar_select %p26_p1, %s3428_s11, %s28_s16  }
   0xd   : > { %p3496_p5 = por %p36_p2, %p35_p0  ;;  %p3500_p6 = por %p42_p4, %p41_p3 }
   0xe   : > { %p91_p7 = scmp.eq.s32.totalorder %s3478_s13, 1  ;;  %p97_p8 = scmp.eq.s32.totalorder %s2861_s14, 1 }
   0xf   : > { %s3934_s20 = scalar_select %p3500_p6, 1, 0 }
  0x10   : > { %p3269_p10 = scmp.lt.s32.totalorder %s3432_s12, 2  ;;  %p3507_p11 = por %p91_p7, %p35_p0 }
  0x11   : > { %p3511_p12 = por %p97_p8, %p41_p3  ;;  %s3516_s23 = sand.u32 1, %s3428_s11  }
  0x12   : > { %s3935_s21 = scalar_select %p3507_p11, 1, 0 }
  0x13   : > { %s3936_s22 = scalar_select %p3511_p12, 1, 0 }
  0x14   : > { %s2939_s24 = sshll.u32 %s3432_s12, 10  ;;  %s2864_s25 = sshll.u32 %s3516_s23, 6 }
  0x15   : > { %s3525_s28 = scalar_lea.hbm %s3928_s0, %s2939_s24  ;;  %s121_s29 = scalar_lea.vmem [#allocation2], %s2864_s25 }
  0x16   : > { %s129_s30 = sshll.u32 %s121_s29, 4  ;;  %p3531_p13 = pnand %p3269_p10, %p3496_p5  ;;  %s3535_s30 = int_to_ptr.vmem [resolvable:$true] %s129_s30 }
  0x17   : > { %s118_s4 = scalar_lea.sflag [#allocation3], %s3516_s23  ;;  %s3308_s5 = scalar_lea.hbm %s3525_s28, 1024 }
  0x18   : > { %p3309_p0 = scmp.ne.s32.totalorder %s3525_s28, %s3308_s5  ;;  %p3310_p1 = pneg %p3531_p13 }
  0x19   : > { %s3313_s8 = scalar_lea.hbm %s3928_s0, 2048  ;;  %p3314_p4 = scmp.lt.s32.totalorder %s3525_s28, %s3928_s0 }
  0x1a   : > { %p3311_p2 = pnand %p3310_p1, %p3309_p0  ;;  %p3315_p5 = scmp.lt.s32.totalorder %s3313_s8, %s3308_s5 }
  0x1c   : > { %p3312_p3 = pneg %p3311_p2  ;;  %p3316_p7 = por %p3315_p5, %p3314_p4 }
  0x1e   : > { %p3317_p8 = pnand %p3316_p7, %p3312_p3 }
  0x20   : > { %3320 = shalt.err (!%p3317_p8)
}
  0x21   : > { %s3321_s17 = scalar_lea.vmem %s3535_s30, 1024  ;;  %s3434_s19 = smov [#allocation2]  }
  0x22   : > { %p3322_p10 = scmp.ne.s32.totalorder %s3535_s30, %s3321_s17  ;;  %s3326_s26 = sshll.u32 %s3434_s19, 4  ;;  %s3327_s26 = int_to_ptr.vmem [resolvable:$false] %s3326_s26 }
  0x23   : > { %s3328_s27 = scalar_lea.vmem %s3327_s26, 2048  ;;  %p3329_p9 = scmp.lt.s32.totalorder %s3535_s30, %s3327_s26 }
  0x24   : > { %p3324_p0 = pnand %p3322_p10, %p3310_p1  ;;  %p3330_p12 = scmp.lt.s32.totalorder %s3328_s27, %s3321_s17 }
  0x26   : > { %p3325_p2 = pneg %p3324_p0  ;;  %p3331_p11 = por %p3330_p12, %p3329_p9 }
  0x28   : > { %p3332_p4 = pnand %p3331_p11, %p3325_p2 }
  0x2a   : > { %3335 = shalt.err (!%p3332_p4)
}
  0x2b   : > { %s3435_s29 = smov 128   ;;  %s3436_s5 = smov 8  }
  0x2c   : > { %3261 = dma.hbm_to_vmem [thread:$0]  (!%p3531_p13), %s3525_s28, 1024, %s3535_s30, %s118_s4, %s3435_s29, %s3435_s29, %s3436_s5  }
  0x2d   : > { %p2872_p9 = scmp.ge.s32.totalorder %s3432_s12, 1  ;;  %p159_p11 = scmp.lt.s32.totalorder %s3432_s12, 3 }
  0x2e   : > { %s3578_s14 = scalar_lea.hbm %s3929_s1, %s2939_s24  ;;  %s143_s16 = scalar_lea.vmem [#allocation5], %s2864_s25 }
  0x2f   : > { %p3569_p12 = pnand %p2872_p9, %p159_p11  ;;  %s151_s17 = sshll.u32 %s143_s16, 4  ;;  %s3582_s17 = int_to_ptr.vmem [resolvable:$true] %s151_s17 }
  0x30   : > { %s140_s28 = scalar_lea.sflag [#allocation6], %s3516_s23  ;;  %s3336_s30 = scalar_lea.hbm %s3578_s14, 1024 }
  0x31   : > { %p3337_p3 = scmp.ne.s32.totalorder %s3578_s14, %s3336_s30  ;;  %s3341_s24 = scalar_lea.hbm %s3929_s1, 2048 }
  0x32   : > { %p3342_p8 = scmp.lt.s32.totalorder %s3578_s14, %s3929_s1  ;;  %p3343_p10 = scmp.lt.s32.totalorder %s3341_s24, %s3336_s30 }
  0x33   : > { %p3339_p5 = pnand %p3337_p3, %p3310_p1 }
  0x34   : > { %p3344_p0 = por %p3343_p10, %p3342_p8 }
  0x35   : > { %p3340_p7 = pneg %p3339_p5 }
  0x37   : > { %p3345_p2 = pnand %p3344_p0, %p3340_p7 }
  0x39   : > { %3348 = shalt.err (!%p3345_p2)
}
  0x3a   : > { %s3349_s23 = scalar_lea.vmem %s3582_s17, 1024  ;;  %s3437_s25 = smov [#allocation5]  }
  0x3b   : > { %p3350_p4 = scmp.ne.s32.totalorder %s3582_s17, %s3349_s23  ;;  %s3354_s7 = sshll.u32 %s3437_s25, 4  ;;  %s3355_s7 = int_to_ptr.vmem [resolvable:$false] %s3354_s7 }
  0x3c   : > { %s3356_s8 = scalar_lea.vmem %s3355_s7, 2048  ;;  %p3357_p3 = scmp.lt.s32.totalorder %s3582_s17, %s3355_s7 }
  0x3d   : > { %p3352_p9 = pnand %p3350_p4, %p3310_p1  ;;  %p3358_p5 = scmp.lt.s32.totalorder %s3356_s8, %s3349_s23 }
  0x3f   : > { %p3353_p11 = pneg %p3352_p9  ;;  %p3359_p6 = por %p3358_p5, %p3357_p3 }
  0x41   : > { %p3360_p8 = pnand %p3359_p6, %p3353_p11 }
  0x43   : > { %3363 = shalt.err (!%p3360_p8)
}
  0x44   : > { %3264 = dma.hbm_to_vmem [thread:$0]  (!%p3531_p13), %s3578_s14, 1024, %s3582_s17, %s140_s28, %s3435_s29, %s3435_s29, %s3436_s5  }
  0x45   : > { %163 = sbr.rel (%p3569_p12) target bundleno = 1439 (0x59f), region = 28  ;;  %s3613_s16 = sand.u32 (!%p3569_p12), 1, %s3424_s10  }
  0x46   : > { %s3616_s30 = sshll.u32 (!%p3569_p12), %s3613_s16, 6  ;;  %s166_s4 = scalar_lea.sflag (!%p3569_p12), [#allocation3], %s3613_s16 }
  0x47   : > { %s169_s3 = scalar_lea.vmem (!%p3569_p12), [#allocation2], %s3616_s30  ;;  %p3939_p6 = scmp.ne.s32.totalorder (!%p3569_p12), %s3934_s20, 0 }
  0x4a   : > { %3407 = dma.done.wait (%p3939_p6), %s166_s4, 1024  }
  0x4b   : > { %3409 = vsyncadd (%p3939_p6), %s166_s4, 4294966272  ;;  %s175_s29 = scalar_lea.sflag [#allocation6], %s3613_s16  ;;  %s3626_s5 = scalar_lea.vmem [#allocation5], %s3616_s30 }
  0x4c   : > { %3411 = dma.done.wait (%p3939_p6), %s175_s29, 1024  }
  0x4d   : > { %3413 = vsyncadd (%p3939_p6), %s175_s29, 4294966272  ;;  %v209_v0 = vld [vmem:[%s169_s3 + $0x10] sm:$0xff]  ;;  %v207_v1 = vld [vmem:[%s169_s3] sm:$0xff]  ;;  %vm359_vm0 = vcmask 130048   ;;  %vm2741_vm3 = vcmask 261120   ;;  %s203_s20 = scalar_lea.vmem [#allocation7], %s3616_s30 }
  0x4e   : > { %247 = vxpose.xlu1.b32.start [1/2] (short) (narrow) %v209_v0, 16  ;;  %215 = vxpose.xlu0.b32.start [1/2] (short) (narrow) %v207_v1, 16  ;;  %v210_v2 = vld [vmem:[%s169_s3 + $0x18] sm:$0xff]  ;;  %v208_v3 = vld [vmem:[%s169_s3 + $0x8] sm:$0xff]  ;;  %v213_v4 = vld [vmem:[%s169_s3 + $0x30] sm:$0xff]  ;;  %s2765_s6 = sshll.u32 %s203_s20, 4  ;;  %s3876_s6 = int_to_ptr.vmem [resolvable:$true] %s2765_s6 }
  0x4f   : > { %v211_v5 = vld [vmem:[%s169_s3 + $0x20] sm:$0xff]  ;;  %v214_v6 = vld [vmem:[%s169_s3 + $0x38] sm:$0xff]  ;;  %v212_v7 = vld [vmem:[%s169_s3 + $0x28] sm:$0xff]  ;;  %s2943_s14 = sshll.u32 %s3478_s13, 10  ;;  %s2751_s13 = scalar_lea.sflag [#allocation4], %s3613_s16 }
  0x50   : > { %s3882_s19 = scalar_lea.hbm %s3930_s2, %s2943_s14  ;;  %s3364_s24 = scalar_lea.vmem %s3876_s6, 1024 }
  0x51   : > { %p3365_p13 = scmp.ne.s32.totalorder %s3876_s6, %s3364_s24  ;;  %p3940_p1 = scmp.ne.s32.totalorder %s3935_s21, 0 }
  0x52   : > { %248 = vxpose.xlu1.b32.end [2/2] (short) (narrow) %v210_v2, 16  ;;  %216 = vxpose.xlu0.b32.end [2/2] (short) (narrow) %v208_v3, 16  ;;  %s3439_s26 = smov [#allocation7]  }
  0x53   : > { %p3366_p12 = pnand %p3365_p13, %p3940_p1  ;;  %s3368_s27 = sshll.u32 %s3439_s26, 4  ;;  %s3369_s27 = int_to_ptr.vmem [resolvable:$false] %s3368_s27 }
  0x54   : > { %s3370_s23 = scalar_lea.vmem %s3369_s27, 2048  ;;  %p3371_p10 = scmp.lt.s32.totalorder %s3876_s6, %s3369_s27 }
  0x55   : > { %p3367_p7 = pneg %p3366_p12  ;;  %p3372_p0 = scmp.lt.s32.totalorder %s3370_s23, %s3364_s24 }
  0x56   : > { %311 = vxpose.xlu1.b32.start [1/2] (short) (narrow) %v213_v4, 16  ;;  %279 = vxpose.xlu0.b32.start [1/2] (short) (narrow) %v211_v5, 16 }
  0x57   : > { %p3373_p2 = por %p3372_p0, %p3371_p10 }
  0x59   : > { %p3374_p4 = pnand %p3373_p2, %p3367_p7 }
  0x5a   : > { %312 = vxpose.xlu1.b32.end [2/2] (short) (narrow) %v214_v6, 16  ;;  %280 = vxpose.xlu0.b32.end [2/2] (short) (narrow) %v212_v7, 16 }
  0xca   : > { %v263_v8 = vpop.trf.xlu1  ;;  %v231_v9 = vpop.trf.xlu0 }
  0xcb   : > { %v345_v10 = vsub.f32 %v209_v0, %v263_v8  ;;  %v343_v11 = vsub.f32 %v207_v1, %v231_v9 }
  0xcd   : > { %v3632_v12 = vmul.f32 0.125, %v345_v10  ;;  %v3634_v13 = vmul.f32 0.125, %v343_v11 }
  0xce   : > { %v264_v14 = vpop.trf.xlu1  ;;  %v232_v15 = vpop.trf.xlu0 }
  0xcf   : > { %v346_v16 = vsub.f32 %v210_v2, %v264_v14  ;;  %v344_v17 = vsub.f32 %v208_v3, %v232_v15  ;;  %3060 = vmatprep.mubr.msk.f32.mxu0 %vm359_vm0, %v3634_v13  ;;  %3067 = vmatprep.mubr.msk.f32.mxu1 %vm359_vm0, %v3632_v12  ;;  %v1308_v53 = vmul.f32 0.008333334, %v3634_v13  ;;  %v1310_v55 = vmul.f32 0.008333334, %v3632_v12 }
  0xd1   : > { %v3640_v18 = vmul.f32 0.125, %v346_v16  ;;  %v3642_v19 = vmul.f32 0.125, %v344_v17 }
  0xd2   : > { %v327_v20 = vpop.trf.xlu1  ;;  %v295_v21 = vpop.trf.xlu0 }
  0xd3   : > { %v349_v22 = vsub.f32 %v213_v4, %v327_v20  ;;  %v347_v23 = vsub.f32 %v211_v5, %v295_v21  ;;  %3056 = vmatprep.subr.mxu0 %v3642_v19  ;;  %3063 = vmatprep.subr.mxu1 %v3640_v18  ;;  %v1309_v60 = vmul.f32 0.008333334, %v3642_v19  ;;  %v1311_v61 = vmul.f32 0.008333334, %v3640_v18 }
  0xd4   : > { %3057 = vmatpush3.msra.mxu0 %v3642_v19  ;;  %3064 = vmatpush3.msra.mxu1 %v3640_v18 }
  0xd5   : > { %v3648_v24 = vmul.f32 0.125, %v349_v22  ;;  %v3650_v25 = vmul.f32 0.125, %v347_v23  ;;  %3058 = vmatprep.subr.mxu0 %v3634_v13  ;;  %3065 = vmatprep.subr.mxu1 %v3632_v12 }
  0xd6   : > { %3066 = vmatpush3.msra.mxu1 %v3632_v12  ;;  %v328_v26 = vpop.trf.xlu1  ;;  %3059 = vmatpush3.msra.mxu0 %v3634_v13  ;;  %v296_v27 = vpop.trf.xlu0 }
  0xd7   : > { %v350_v28 = vsub.f32 %v214_v6, %v328_v26  ;;  %v348_v29 = vsub.f32 %v212_v7, %v296_v27  ;;  %3061 = vmatmul.mubr.msk.f32.vlgmr.msra.gmra.mxu0 %vm359_vm0, %v3642_v19  ;;  %3068 = vmatmul.mubr.msk.f32.vlgmr.msra.gmra.mxu1 %vm359_vm0, %v3640_v18  ;;  %v1312_v2 = vmul.f32 0.008333334, %v3650_v25  ;;  %v1314_v5 = vmul.f32 0.008333334, %v3648_v24 }
  0xd8   : > { %3074 = vmatprep.mubr.msk.f32.mxu0 %vm359_vm0, %v3650_v25  ;;  %3081 = vmatprep.mubr.msk.f32.mxu1 %vm359_vm0, %v3648_v24 }
  0xd9   : > { %v3664_v30 = vmul.f32 0.125, %v350_v28  ;;  %v3666_v31 = vmul.f32 0.125, %v348_v29 }
  0xdb   : > { %3070 = vmatprep.subr.mxu0 %v3666_v31  ;;  %3077 = vmatprep.subr.mxu1 %v3664_v30  ;;  %v1313_v4 = vmul.f32 0.008333334, %v3666_v31  ;;  %v1315_v26 = vmul.f32 0.008333334, %v3664_v30 }
  0xdc   : > { %3071 = vmatpush3.msra.mxu0 %v3666_v31  ;;  %3078 = vmatpush3.msra.mxu1 %v3664_v30 }
  0xdd   : > { %3072 = vmatprep.subr.mxu0 %v3650_v25  ;;  %3079 = vmatprep.subr.mxu1 %v3648_v24 }
  0xde   : > { %3073 = vmatpush3.msra.mxu0 %v3650_v25  ;;  %3080 = vmatpush3.msra.mxu1 %v3648_v24 }
  0xdf   : > { %3075 = vmatmul.mubr.msk.f32.vlgmr.msra.gmra.mxu0 %vm359_vm0, %v3666_v31  ;;  %3082 = vmatmul.mubr.msk.f32.vlgmr.msra.gmra.mxu1 %vm359_vm0, %v3664_v30 }
  0xe0   : > { %3088 = vmatprep.mubr.msk.f32.mxu0 %vm359_vm0, %v3634_v13  ;;  %3095 = vmatprep.mubr.msk.f32.mxu1 %vm359_vm0, %v3632_v12 }
 0x197   : > { %v3684_v32 = vpop.f32.mrf.mxu0  ;;  %v3686_v33 = vpop.f32.mrf.mxu1 }
 0x198   : > { %3084 = vmatprep.subr.mxu0 %v3684_v32  ;;  %3091 = vmatprep.subr.mxu1 %v3686_v33  ;;  %v1365_v40 = vmul.f32 0.5, %v3684_v32  ;;  %v1367_v41 = vmul.f32 0.5, %v3686_v33  ;;  %v1317_v3 = vmul.f32 0.0013888889, %v3684_v32  ;;  %v1319_v6 = vmul.f32 0.0013888889, %v3686_v33 }
 0x199   : > { %v3690_v34 = vpop.f32.mrf.mxu0  ;;  %v3692_v35 = vpop.f32.mrf.mxu1  ;;  %3085 = vmatpush3.msra.mxu0 %v3684_v32  ;;  %3092 = vmatpush3.msra.mxu1 %v3686_v33 }
 0x19a   : > { %3086 = vmatprep.subr.mxu0 %v3690_v34  ;;  %3093 = vmatprep.subr.mxu1 %v3692_v35  ;;  %v1364_v42 = vmul.f32 0.5, %v3690_v34  ;;  %v1366_v45 = vmul.f32 0.5, %v3692_v35  ;;  %v1373_v46 = vadd.f32 %v1365_v40, %v3642_v19  ;;  %v1375_v48 = vadd.f32 %v1367_v41, %v3640_v18 }
 0x19b   : > { %3087 = vmatpush3.msra.mxu0 %v3690_v34  ;;  %3094 = vmatpush3.msra.mxu1 %v3692_v35  ;;  %v1316_v7 = vmul.f32 0.0013888889, %v3690_v34  ;;  %v1318_v8 = vmul.f32 0.0013888889, %v3692_v35  ;;  %v1325_v21 = vadd.f32 %v1317_v3, %v1309_v60  ;;  %v1327_v27 = vadd.f32 %v1319_v6, %v1311_v61 }
 0x19c   : > { %3089 = vmatmul.mubr.msk.f32.vlgmr.msra.gmra.mxu0 %vm359_vm0, %v3642_v19  ;;  %3096 = vmatmul.mubr.msk.f32.vlgmr.msra.gmra.mxu1 %vm359_vm0, %v3640_v18  ;;  %v1372_v54 = vadd.f32 %v1364_v42, %v3634_v13  ;;  %v1374_v58 = vadd.f32 %v1366_v45, %v3632_v12 }
 0x19d   : > { %3102 = vmatprep.mubr.msk.f32.mxu0 %vm359_vm0, %v3650_v25  ;;  %3109 = vmatprep.mubr.msk.f32.mxu1 %vm359_vm0, %v3648_v24  ;;  %v1324_v28 = vadd.f32 %v1316_v7, %v1308_v53 }
 0x19f   : > { %v3708_v36 = vpop.f32.mrf.mxu0  ;;  %v3710_v37 = vpop.f32.mrf.mxu1 }
 0x1a0   : > { %3098 = vmatprep.subr.mxu0 %v3708_v36  ;;  %3105 = vmatprep.subr.mxu1 %v3710_v37  ;;  %v1369_v62 = vmul.f32 0.5, %v3708_v36  ;;  %v1371_v1 = vmul.f32 0.5, %v3710_v37  ;;  %v1321_v11 = vmul.f32 0.0013888889, %v3708_v36  ;;  %v1323_v14 = vmul.f32 0.0013888889, %v3710_v37 }
 0x1a1   : > { %v3714_v38 = vpop.f32.mrf.mxu0  ;;  %v3716_v39 = vpop.f32.mrf.mxu1  ;;  %3099 = vmatpush3.msra.mxu0 %v3708_v36  ;;  %3106 = vmatpush3.msra.mxu1 %v3710_v37 }
 0x1a2   : > { %3100 = vmatprep.subr.mxu0 %v3714_v38  ;;  %3107 = vmatprep.subr.mxu1 %v3716_v39  ;;  %v1377_v12 = vadd.f32 %v1369_v62, %v3666_v31  ;;  %v1379_v17 = vadd.f32 %v1371_v1, %v3664_v30  ;;  %v1322_v41 = vmul.f32 0.0013888889, %v3716_v39 }
 0x1a3   : > { %3101 = vmatpush3.msra.mxu0 %v3714_v38  ;;  %3108 = vmatpush3.msra.mxu1 %v3716_v39 }
 0x1a4   : > { %3103 = vmatmul.mubr.msk.f32.vlgmr.msra.gmra.mxu0 %vm359_vm0, %v3666_v31  ;;  %3110 = vmatmul.mubr.msk.f32.vlgmr.msra.gmra.mxu1 %vm359_vm0, %v3664_v30 }
 0x1a5   : > { %3112 = vmatprep.subr.mxu0 %v3684_v32  ;;  %3119 = vmatprep.subr.mxu1 %v3686_v33 }
 0x1a6   : > { %3113 = vmatpush3.msra.mxu0 %v3684_v32  ;;  %3116 = vmatprep.mubr.msk.f32.mxu0 %vm359_vm0, %v3690_v34 }
 0x1a7   : > { %3120 = vmatpush3.msra.mxu1 %v3686_v33  ;;  %3123 = vmatprep.mubr.msk.f32.mxu1 %vm359_vm0, %v3692_v35 }
 0x1a8   : > { %3114 = vmatprep.subr.mxu0 %v3690_v34  ;;  %3121 = vmatprep.subr.mxu1 %v3692_v35 }
 0x1a9   : > { %3115 = vmatpush3.msra.mxu0 %v3690_v34  ;;  %3122 = vmatpush3.msra.mxu1 %v3692_v35  ;;  %v1331_v34 = vadd.f32 %v1323_v14, %v1315_v26  ;;  %v1320_v35 = vmul.f32 0.0013888889, %v3714_v38 }
 0x1aa   : > { %3117 = vmatmul.mubr.msk.f32.vlgmr.msra.gmra.mxu0 %vm359_vm0, %v3684_v32  ;;  %3124 = vmatmul.mubr.msk.f32.vlgmr.msra.gmra.mxu1 %vm359_vm0, %v3686_v33  ;;  %v1326_v32 = vadd.f32 %v1318_v8, %v1310_v55  ;;  %v1329_v33 = vadd.f32 %v1321_v11, %v1313_v4  ;;  %v1330_v8 = vadd.f32 %v1322_v41, %v1314_v5 }
 0x1ab   : > { %3126 = vmatprep.subr.mxu0 %v3708_v36  ;;  %3133 = vmatprep.subr.mxu1 %v3710_v37  ;;  %v1328_v7 = vadd.f32 %v1320_v35, %v1312_v2 }
 0x1ac   : > { %3127 = vmatpush3.msra.mxu0 %v3708_v36  ;;  %3130 = vmatprep.mubr.msk.f32.mxu0 %vm359_vm0, %v3714_v38 }
 0x1ad   : > { %3134 = vmatpush3.msra.mxu1 %v3710_v37  ;;  %3137 = vmatprep.mubr.msk.f32.mxu1 %vm359_vm0, %v3716_v39 }
 0x1ae   : > { %3128 = vmatprep.subr.mxu0 %v3714_v38  ;;  %3135 = vmatprep.subr.mxu1 %v3716_v39 }
 0x1af   : > { %3129 = vmatpush3.msra.mxu0 %v3714_v38  ;;  %3136 = vmatpush3.msra.mxu1 %v3716_v39 }
 0x1b0   : > { %3131 = vmatmul.mubr.msk.f32.vlgmr.msra.gmra.mxu0 %vm359_vm0, %v3708_v36  ;;  %3138 = vmatmul.mubr.msk.f32.vlgmr.msra.gmra.mxu1 %vm359_vm0, %v3710_v37 }
 0x25c   : > { %v3090_v43 = vpop.f32.mrf.mxu0  ;;  %v3097_v44 = vpop.f32.mrf.mxu1 }
 0x25d   : > { %v1381_v47 = vmul.f32 0.16666667, %v3090_v43  ;;  %v1383_v49 = vmul.f32 0.16666667, %v3097_v44  ;;  %v1333_v15 = vmul.f32 0.0001984127, %v3090_v43 }
 0x25e   : > { %v750_v50 = vpop.f32.mrf.mxu0  ;;  %v825_v51 = vpop.f32.mrf.mxu1  ;;  %v1335_v16 = vmul.f32 0.0001984127, %v3097_v44 }
 0x25f   : > { %v3766_v52 = vadd.f32 %v1381_v47, %v1373_v46  ;;  %v3771_v56 = vadd.f32 %v1383_v49, %v1375_v48  ;;  %v1380_v57 = vmul.f32 0.16666667, %v750_v50  ;;  %v1382_v59 = vmul.f32 0.16666667, %v825_v51 }
 0x260   : > { %v1332_v22 = vmul.f32 0.0001984127, %v750_v50  ;;  %v1334_v29 = vmul.f32 0.0001984127, %v825_v51  ;;  %v1341_v36 = vadd.f32 %v1333_v15, %v1325_v21  ;;  %v1343_v37 = vadd.f32 %v1335_v16, %v1327_v27 }
 0x261   : > { %v3777_v63 = vadd.f32 %v1380_v57, %v1372_v54  ;;  %v3779_v0 = vadd.f32 %v1382_v59, %v1374_v58 }
 0x262   : > { %v1340_v44 = vadd.f32 %v1332_v22, %v1324_v28  ;;  %v1342_v47 = vadd.f32 %v1334_v29, %v1326_v32  ;;  %v1744_v29 = vlaneseq }
 0x264   : > { %v3104_v9 = vpop.f32.mrf.mxu0  ;;  %v3111_v10 = vpop.f32.mrf.mxu1 }
 0x265   : > { %v1385_v13 = vmul.f32 0.16666667, %v3104_v9  ;;  %v1387_v18 = vmul.f32 0.16666667, %v3111_v10  ;;  %v1337_v40 = vmul.f32 0.0001984127, %v3104_v9 }
 0x266   : > { %v3793_v19 = vpop.f32.mrf.mxu0  ;;  %v3795_v20 = vpop.f32.mrf.mxu1  ;;  %v1339_v48 = vmul.f32 0.0001984127, %v3111_v10 }
 0x267   : > { %v3797_v23 = vadd.f32 %v1385_v13, %v1377_v12  ;;  %v3800_v31 = vadd.f32 %v1387_v18, %v1379_v17  ;;  %v1336_v49 = vmul.f32 0.0001984127, %v3793_v19  ;;  %v1338_v1 = vmul.f32 0.0001984127, %v3795_v20 }
 0x268   : > { %v1345_v11 = vadd.f32 %v1337_v40, %v1329_v33  ;;  %v1347_v14 = vadd.f32 %v1339_v48, %v1331_v34  ;;  %v1368_v33 = vmul.f32 0.5, %v3714_v38  ;;  %v1370_v34 = vmul.f32 0.5, %v3716_v39 }
 0x269   : > { %v1344_v15 = vadd.f32 %v1336_v49, %v1328_v7  ;;  %v1346_v2 = vadd.f32 %v1338_v1, %v1330_v8  ;;  %v1384_v40 = vmul.f32 0.16666667, %v3793_v19 }
 0x26a   : > { %v3118_v42 = vpop.f32.mrf.mxu0  ;;  %v3125_v43 = vpop.f32.mrf.mxu1  ;;  %v1378_v49 = vadd.f32 %v1370_v34, %v3648_v24 }
 0x26b   : > { %v1349_v45 = vmul.f32 2.4801588e-05, %v3118_v42  ;;  %v1397_v30 = vmul.f32 0.041666668, %v3118_v42  ;;  %v1351_v46 = vmul.f32 2.4801588e-05, %v3125_v43 }
 0x26c   : > { %v1399_v50 = vmul.f32 0.041666668, %v3125_v43  ;;  %v1056_v51 = vpop.f32.mrf.mxu0  ;;  %v1137_v53 = vpop.f32.mrf.mxu1 }
 0x26d   : > { %v1348_v54 = vmul.f32 2.4801588e-05, %v1056_v51  ;;  %v1396_v55 = vmul.f32 0.041666668, %v1056_v51  ;;  %v1350_v57 = vmul.f32 2.4801588e-05, %v1137_v53  ;;  %3144 = vmatprep.mubr.msk.f32.mxu0 %vm359_vm0, %v1056_v51  ;;  %3151 = vmatprep.mubr.msk.f32.mxu1 %vm359_vm0, %v1137_v53  ;;  %v1357_v58 = vadd.f32 %v1349_v45, %v1341_v36 }
 0x26e   : > { %v1398_v59 = vmul.f32 0.041666668, %v1137_v53  ;;  %v1359_v60 = vadd.f32 %v1351_v46, %v1343_v37  ;;  %v3808_v61 = vadd.f32 %v1397_v30, %v3766_v52  ;;  %v3811_v62 = vadd.f32 %v1399_v50, %v3771_v56 }
 0x26f   : > { %3140 = vmatprep.subr.mxu0 %v1357_v58  ;;  %v1356_v3 = vadd.f32 %v1348_v54, %v1340_v44  ;;  %v1358_v4 = vadd.f32 %v1350_v57, %v1342_v47  ;;  %v3815_v6 = vadd.f32 %v1396_v55, %v3777_v63  ;;  %v3438_v36 = vmov 0.0  }
 0x270   : > { %v3132_v9 = vpop.f32.mrf.mxu0  ;;  %v3139_v10 = vpop.f32.mrf.mxu1  ;;  %3147 = vmatprep.subr.mxu1 %v1359_v60  ;;  %3141 = vmatpush3.msra.mxu0 %v1357_v58  ;;  %v3818_v52 = vadd.f32 %v1398_v59, %v3779_v0  ;;  %v1376_v46 = vadd.f32 %v1368_v33, %v3650_v25 }
 0x271   : > { %v1353_v56 = vmul.f32 2.4801588e-05, %v3132_v9  ;;  %v1401_v12 = vmul.f32 0.041666668, %v3132_v9  ;;  %v1355_v13 = vmul.f32 2.4801588e-05, %v3139_v10  ;;  %3148 = vmatpush3.msra.mxu1 %v1359_v60  ;;  %3142 = vmatprep.subr.mxu0 %v1356_v3 }
 0x272   : > { %v1403_v16 = vmul.f32 0.041666668, %v3139_v10  ;;  %v1218_v63 = vpop.f32.mrf.mxu0  ;;  %v1299_v17 = vpop.f32.mrf.mxu1  ;;  %3149 = vmatprep.subr.mxu1 %v1358_v4  ;;  %3143 = vmatpush3.msra.mxu0 %v1356_v3  ;;  %v1392_v53 = vadd.f32 %v1384_v40, %v1376_v46 }
 0x273   : > { %v1352_v5 = vmul.f32 2.4801588e-05, %v1218_v63  ;;  %v1354_v18 = vmul.f32 2.4801588e-05, %v1299_v17  ;;  %3150 = vmatpush3.msra.mxu1 %v1358_v4  ;;  %3145 = vmatmul.mubr.msk.f32.vlgmr.msra.gmra.mxu0 %vm359_vm0, %v3118_v42  ;;  %v1361_v0 = vadd.f32 %v1353_v56, %v1345_v11  ;;  %v1363_v21 = vadd.f32 %v1355_v13, %v1347_v14 }
 0x274   : > { %3152 = vmatmul.mubr.msk.f32.vlgmr.msra.gmra.mxu1 %vm359_vm0, %v3125_v43  ;;  %3158 = vmatprep.mubr.msk.f32.mxu0 %vm359_vm0, %v1218_v63  ;;  %v1409_v22 = vadd.f32 %v1401_v12, %v3797_v23  ;;  %v1411_v26 = vadd.f32 %v1403_v16, %v3800_v31  ;;  %v1745_v23 = vshrl.u32 %v1744_v29, 7  ;;  %v1748_v31 = vand.u32 127, %v1744_v29  ;;  %v2412_v16 = vld [vmem:[%s3626_s5 + $0x18] sm:$0xff] }
 0x275   : > { %3154 = vmatprep.subr.mxu0 %v1361_v0  ;;  %3165 = vmatprep.mubr.msk.f32.mxu1 %vm359_vm0, %v1299_v17  ;;  %v1360_v27 = vadd.f32 %v1352_v5, %v1344_v15  ;;  %v1362_v28 = vadd.f32 %v1354_v18, %v1346_v2  ;;  %v1386_v43 = vmul.f32 0.16666667, %v3795_v20  ;;  %v1400_v38 = vmul.f32 0.041666668, %v1218_v63  ;;  %v2410_v15 = vld [vmem:[%s3626_s5 + $0x8] sm:$0xff]  ;;  %v2409_v63 = vld [vmem:[%s3626_s5] sm:$0xff] }
 0x276   : > { %3161 = vmatprep.subr.mxu1 %v1363_v21  ;;  %3155 = vmatpush3.msra.mxu0 %v1361_v0  ;;  %v1746_v32 = vadd.s32 8, %v1745_v23  ;;  %vm1749_vm2 = vcmp.eq.s32.totalorder %v1745_v23, %v1748_v31  ;;  %v1402_v50 = vmul.f32 0.041666668, %v1299_v17  ;;  %v2411_v17 = vld [vmem:[%s3626_s5 + $0x10] sm:$0xff]  ;;  %v2414_v2 = vld [vmem:[%s3626_s5 + $0x28] sm:$0xff]  ;;  %v2416_v5 = vld [vmem:[%s3626_s5 + $0x38] sm:$0xff] }
 0x277   : > { %3162 = vmatpush3.msra.mxu1 %v1363_v21  ;;  %3156 = vmatprep.subr.mxu0 %v1360_v27  ;;  %v1751_v30 = vsel %vm1749_vm2, 1.0, %v3438_v36  ;;  %v1394_v20 = vadd.f32 %v1386_v43, %v1378_v49  ;;  %v1408_v59 = vadd.f32 %v1400_v38, %v1392_v53 }
 0x278   : > { %3163 = vmatprep.subr.mxu1 %v1362_v28  ;;  %3157 = vmatpush3.msra.mxu0 %v1360_v27  ;;  %vm1750_vm1 = vcmp.eq.s32.totalorder %v1746_v32, %v1748_v31  ;;  %v2415_v27 = vld [vmem:[%s3626_s5 + $0x30] sm:$0xff] }
 0x279   : > { %3164 = vmatpush3.msra.mxu1 %v1362_v28  ;;  %3159 = vmatmul.mubr.msk.f32.vlgmr.msra.gmra.mxu0 %vm359_vm0, %v3132_v9  ;;  %v1752_v37 = vsel %vm1750_vm1, 1.0, %v3438_v36  ;;  %v1410_v24 = vadd.f32 %v1402_v50, %v1394_v20 }
 0x27a   : > { %3166 = vmatmul.mubr.msk.f32.vlgmr.msra.gmra.mxu1 %vm359_vm0, %v3139_v10 }
 0x333   : > { %v3146_v35 = vpop.f32.mrf.mxu0 }
 0x334   : > { %v1737_v41 = vadd.f32 %v3146_v35, %v3808_v61  ;;  %v3153_v42 = vpop.f32.mrf.mxu1 }
 0x335   : > { %v1739_v44 = vadd.f32 %v3153_v42, %v3811_v62  ;;  %v1484_v45 = vpop.f32.mrf.mxu0 }
 0x336   : > { %v1754_v47 = vadd.f32 %v1752_v37, %v1737_v41  ;;  %v1736_v39 = vadd.f32 %v1484_v45, %v3815_v6  ;;  %v1565_v48 = vpop.f32.mrf.mxu1 }
 0x337   : > { %v1756_v19 = vadd.f32 %v1752_v37, %v1739_v44  ;;  %v1738_v51 = vadd.f32 %v1565_v48, %v3818_v52 }
 0x338   : > { %v1753_v54 = vadd.f32 %v1751_v30, %v1736_v39  ;;  %3168 = vmatprep.subr.mxu0 %v1754_v47 }
 0x339   : > { %v1755_v55 = vadd.f32 %v1751_v30, %v1738_v51  ;;  %v3160_v57 = vpop.f32.mrf.mxu0  ;;  %3175 = vmatprep.subr.mxu1 %v1756_v19  ;;  %3169 = vmatpush3.msra.mxu0 %v1754_v47 }
 0x33a   : > { %v1741_v25 = vadd.f32 %v3160_v57, %v1409_v22  ;;  %v3167_v58 = vpop.f32.mrf.mxu1  ;;  %3176 = vmatpush3.msra.mxu1 %v1756_v19  ;;  %3170 = vmatprep.subr.mxu0 %v1753_v54 }
 0x33b   : > { %v1743_v60 = vadd.f32 %v3167_v58, %v1411_v26  ;;  %v1646_v61 = vpop.f32.mrf.mxu0  ;;  %3172 = vmatprep.mubr.msk.f32.mxu0 %vm359_vm0, %v1753_v54  ;;  %3177 = vmatprep.subr.mxu1 %v1755_v55  ;;  %v2413_v26 = vld [vmem:[%s3626_s5 + $0x20] sm:$0xff] }
 0x33c   : > { %v1758_v62 = vadd.f32 %v1752_v37, %v1741_v25  ;;  %v1740_v1 = vadd.f32 %v1646_v61, %v1408_v59  ;;  %v1727_v3 = vpop.f32.mrf.mxu1  ;;  %3179 = vmatprep.mubr.msk.f32.mxu1 %vm359_vm0, %v1755_v55  ;;  %3171 = vmatpush3.msra.mxu0 %v1753_v54 }
 0x33d   : > { %v1760_v4 = vadd.f32 %v1752_v37, %v1743_v60  ;;  %v1742_v6 = vadd.f32 %v1727_v3, %v1410_v24  ;;  %3178 = vmatpush3.msra.mxu1 %v1755_v55  ;;  %3173 = vmatmul.mubr.msk.f32.vlgmr.msra.gmra.mxu0 %vm359_vm0, %v1754_v47 }
 0x33e   : > { %v1757_v7 = vadd.f32 %v1751_v30, %v1740_v1  ;;  %3180 = vmatmul.mubr.msk.f32.vlgmr.msra.gmra.mxu1 %vm359_vm0, %v1756_v19  ;;  %3182 = vmatprep.subr.mxu0 %v1758_v62 }
 0x33f   : > { %v1759_v8 = vadd.f32 %v1751_v30, %v1742_v6  ;;  %3189 = vmatprep.subr.mxu1 %v1760_v4  ;;  %3183 = vmatpush3.msra.mxu0 %v1758_v62 }
 0x340   : > { %3190 = vmatpush3.msra.mxu1 %v1760_v4  ;;  %3184 = vmatprep.subr.mxu0 %v1757_v7 }
 0x341   : > { %3186 = vmatprep.mubr.msk.f32.mxu0 %vm359_vm0, %v1757_v7  ;;  %3191 = vmatprep.subr.mxu1 %v1759_v8 }
 0x342   : > { %3193 = vmatprep.mubr.msk.f32.mxu1 %vm359_vm0, %v1759_v8  ;;  %3185 = vmatpush3.msra.mxu0 %v1757_v7 }
 0x343   : > { %3192 = vmatpush3.msra.mxu1 %v1759_v8  ;;  %3187 = vmatmul.mubr.msk.f32.vlgmr.msra.gmra.mxu0 %vm359_vm0, %v1758_v62 }
 0x344   : > { %3194 = vmatmul.mubr.msk.f32.vlgmr.msra.gmra.mxu1 %vm359_vm0, %v1760_v4 }
 0x3fd   : > { %v3174_v9 = vpop.f32.mrf.mxu0 }
 0x3fe   : > { %v3181_v10 = vpop.f32.mrf.mxu1  ;;  %3196 = vmatprep.subr.mxu0 %v3174_v9 }
 0x3ff   : > { %3203 = vmatprep.subr.mxu1 %v3181_v10  ;;  %v1833_v52 = vpop.f32.mrf.mxu0  ;;  %3197 = vmatpush3.msra.mxu0 %v3174_v9 }
 0x400   : > { %v1914_v11 = vpop.f32.mrf.mxu1  ;;  %3204 = vmatpush3.msra.mxu1 %v3181_v10  ;;  %3198 = vmatprep.subr.mxu0 %v1833_v52 }
 0x401   : > { %3200 = vmatprep.mubr.msk.f32.mxu0 %vm359_vm0, %v1833_v52  ;;  %3205 = vmatprep.subr.mxu1 %v1914_v11 }
 0x402   : > { %3207 = vmatprep.mubr.msk.f32.mxu1 %vm359_vm0, %v1914_v11  ;;  %3199 = vmatpush3.msra.mxu0 %v1833_v52 }
 0x403   : > { %v3188_v56 = vpop.f32.mrf.mxu0  ;;  %3206 = vmatpush3.msra.mxu1 %v1914_v11  ;;  %3201 = vmatmul.mubr.msk.f32.vlgmr.msra.gmra.mxu0 %vm359_vm0, %v3174_v9 }
 0x404   : > { %v3195_v12 = vpop.f32.mrf.mxu1  ;;  %3208 = vmatmul.mubr.msk.f32.vlgmr.msra.gmra.mxu1 %vm359_vm0, %v3181_v10  ;;  %3210 = vmatprep.subr.mxu0 %v3188_v56 }
 0x405   : > { %3217 = vmatprep.subr.mxu1 %v3195_v12  ;;  %v1995_v13 = vpop.f32.mrf.mxu0  ;;  %3211 = vmatpush3.msra.mxu0 %v3188_v56 }
 0x406   : > { %v2076_v14 = vpop.f32.mrf.mxu1  ;;  %3218 = vmatpush3.msra.mxu1 %v3195_v12  ;;  %3212 = vmatprep.subr.mxu0 %v1995_v13 }
 0x407   : > { %3214 = vmatprep.mubr.msk.f32.mxu0 %vm359_vm0, %v1995_v13  ;;  %3219 = vmatprep.subr.mxu1 %v2076_v14 }
 0x408   : > { %3221 = vmatprep.mubr.msk.f32.mxu1 %vm359_vm0, %v2076_v14  ;;  %3213 = vmatpush3.msra.mxu0 %v1995_v13 }
 0x409   : > { %3220 = vmatpush3.msra.mxu1 %v2076_v14  ;;  %3215 = vmatmul.mubr.msk.f32.vlgmr.msra.gmra.mxu0 %vm359_vm0, %v3188_v56 }
 0x40a   : > { %3222 = vmatmul.mubr.msk.f32.vlgmr.msra.gmra.mxu1 %vm359_vm0, %v3195_v12  ;;  %3224 = vmatprep.subr.mxu0 %v2410_v15 }
 0x40b   : > { %3231 = vmatprep.subr.mxu1 %v2412_v16  ;;  %3225 = vmatpush3.msra.mxu0 %v2410_v15 }
 0x40c   : > { %3232 = vmatpush3.msra.mxu1 %v2412_v16  ;;  %3226 = vmatprep.subr.mxu0 %v2409_v63 }
 0x40d   : > { %3233 = vmatprep.subr.mxu1 %v2411_v17  ;;  %3227 = vmatpush3.msra.mxu0 %v2409_v63 }
 0x40e   : > { %3234 = vmatpush3.msra.mxu1 %v2411_v17  ;;  %3238 = vmatprep.subr.mxu0 %v2414_v2 }
 0x40f   : > { %3245 = vmatprep.subr.mxu1 %v2416_v5 }
 0x4c3   : > { %v3202_v18 = vpop.f32.mrf.mxu0 }
 0x4c4   : > { %v3209_v0 = vpop.f32.mrf.mxu1 }
 0x4c5   : > { %v2157_v21 = vpop.f32.mrf.mxu0 }
 0x4c6   : > { %v2238_v22 = vpop.f32.mrf.mxu1  ;;  %3228 = vmatprep.mubr.msk.f32.mxu0 %vm359_vm0, %v2157_v21 }
 0x4c7   : > { %3235 = vmatprep.mubr.msk.f32.mxu1 %vm359_vm0, %v2238_v22  ;;  %3229 = vmatmul.mubr.msk.f32.vlgmr.msra.gmra.mxu0 %vm359_vm0, %v3202_v18 }
 0x4c8   : > { %3236 = vmatmul.mubr.msk.f32.vlgmr.msra.gmra.mxu1 %vm359_vm0, %v3209_v0  ;;  %3239 = vmatpush3.msra.mxu0 %v2414_v2 }
 0x4c9   : > { %v3216_v28 = vpop.f32.mrf.mxu0  ;;  %3246 = vmatpush3.msra.mxu1 %v2416_v5  ;;  %3240 = vmatprep.subr.mxu0 %v2413_v26 }
 0x4ca   : > { %v3223_v29 = vpop.f32.mrf.mxu1  ;;  %3247 = vmatprep.subr.mxu1 %v2415_v27  ;;  %3241 = vmatpush3.msra.mxu0 %v2413_v26 }
 0x4cb   : > { %v2319_v23 = vpop.f32.mrf.mxu0  ;;  %3248 = vmatpush3.msra.mxu1 %v2415_v27 }
 0x4cc   : > { %v2400_v32 = vpop.f32.mrf.mxu1  ;;  %3242 = vmatprep.mubr.msk.f32.mxu0 %vm359_vm0, %v2319_v23 }
 0x4cd   : > { %3249 = vmatprep.mubr.msk.f32.mxu1 %vm359_vm0, %v2400_v32  ;;  %3243 = vmatmul.mubr.msk.f32.vlgmr.msra.gmra.mxu0 %vm359_vm0, %v3216_v28 }
 0x4ce   : > { %3250 = vmatmul.mubr.msk.f32.vlgmr.msra.gmra.mxu1 %vm359_vm0, %v3223_v29 }
 0x587   : > { %v3230_v31 = vpop.f32.mrf.mxu0 }
 0x588   : > { %2743 = vst.msk [vmem:[%s203_s20 + $0x8] sm:$0xff] %vm2741_vm3, %v3230_v31  ;;  %v3237_v33 = vpop.f32.mrf.mxu1 }
 0x589   : > { %2745 = vst.msk [vmem:[%s203_s20 + $0x18] sm:$0xff] %vm2741_vm3, %v3237_v33  ;;  %v2489_v34 = vpop.f32.mrf.mxu0 }
 0x58a   : > { %2742 = vst.msk [vmem:[%s203_s20] sm:$0xff] %vm2741_vm3, %v2489_v34  ;;  %v2570_v35 = vpop.f32.mrf.mxu1 }
 0x58b   : > { %2744 = vst.msk [vmem:[%s203_s20 + $0x10] sm:$0xff] %vm2741_vm3, %v2570_v35 }
 0x58d   : > { %v3244_v36 = vpop.f32.mrf.mxu0 }
 0x58e   : > { %2747 = vst.msk [vmem:[%s203_s20 + $0x28] sm:$0xff] %vm2741_vm3, %v3244_v36  ;;  %v3251_v37 = vpop.f32.mrf.mxu1 }
 0x58f   : > { %2749 = vst.msk [vmem:[%s203_s20 + $0x38] sm:$0xff] %vm2741_vm3, %v3251_v37  ;;  %v2651_v40 = vpop.f32.mrf.mxu0 }
 0x590   : > { %2746 = vst.msk [vmem:[%s203_s20 + $0x20] sm:$0xff] %vm2741_vm3, %v2651_v40  ;;  %v2732_v41 = vpop.f32.mrf.mxu1 }
 0x591   : > { %2748 = vst.msk [vmem:[%s203_s20 + $0x30] sm:$0xff] %vm2741_vm3, %v2732_v41 }
 0x592   : > { %3377 = shalt.err (!%p3374_p4)
}
 0x593   : > { %s3378_s25 = scalar_lea.hbm %s3882_s19, 1024  ;;  %s3382_s30 = scalar_lea.hbm %s3930_s2, 2048 }
 0x594   : > { %p3379_p9 = scmp.ne.s32.totalorder %s3882_s19, %s3378_s25  ;;  %p3383_p5 = scmp.lt.s32.totalorder %s3882_s19, %s3930_s2 }
 0x595   : > { %p3384_p8 = scmp.lt.s32.totalorder %s3382_s30, %s3378_s25 }
 0x596   : > { %p3380_p11 = pnand %p3379_p9, %p3940_p1 }
 0x597   : > { %p3385_p6 = por %p3384_p8, %p3383_p5 }
 0x598   : > { %p3381_p3 = pneg %p3380_p11 }
 0x59a   : > { %p3386_p13 = pnand %p3385_p6, %p3381_p3 }
 0x59c   : > { %3389 = shalt.err (!%p3386_p13)
}
 0x59d   : > { %s3440_s29 = smov 128   ;;  %s3441_s5 = smov 8  }
 0x59e   : > { %3256 = dma.vmem_to_hbm [thread:$0]  (%p3940_p1), %s3876_s6, 1024, %s3882_s19, %s2751_s13, %s3440_s29, %s3440_s29, %s3441_s5  }
 0x59f PF: > { %s2780_s20 = sand.u32 1, %s3420_s9   ;;  %p3941_p12 = scmp.ne.s32.totalorder %s3936_s22, 0 }
 0x5a0   : > { %p3942_p7 = scmp.ge.s32.totalorder %s3432_s12, 2  ;;  %s2781_s14 = scalar_lea.sflag [#allocation4], %s2780_s20 }
 0x5a2   : > { %p3266_p10 = pnand %p3942_p7, %p3941_p12 }
 0x5a4   : > { %p3267_p0 = pneg %p3266_p10 }
 0x5a6   : > { %3415 = dma.done.wait (%p3267_p0), %s2781_s14, 1024  }
 0x5a7   : > { %3417 = vsyncadd (%p3267_p0), %s2781_s14, 4294966272  ;;  %p18_p2 = scmp.ge.s32.totalorder %s3482_s15, 4   ;;  %s3943_s9 = smov %s3424_s10 }
 0x5a8   : > { %s3944_s10 = smov %s3428_s11  ;;  %s3945_s11 = smov %s3494_s18 }
 0x5a9   : > { %s3946_s12 = smov %s3482_s15  ;;  %20 = sbr.rel (!%p18_p2) target bundleno = 7 (0x7), region = 86 }
 0x5ae   :  { %2786 = vsyncpa [#allocation3], 1 }
 0x5af   :  { %2788 = vsyncpa [#allocation3 + $0x1], 1 }
 0x5b0   :  { %2789 = vsyncpa [#allocation6], 1 }
 0x5b1   :  { %2791 = vsyncpa [#allocation6 + $0x1], 1 }
 0x5b2   :  { %2792 = vsyncpa [#allocation4], 1 }
 0x5b3   :  { %2794 = vsyncpa [#allocation4 + $0x1], 1 }

</bundles_post_ra>
